<compile_context>
chip_gen: v5e
topology: v5e:2x2
jax: 0.10.0
libtpu: 0.0.40
codegen_flags: <defaults>
</compile_context>

<pallas_src>
import functools
from typing import NamedTuple, Any

import numpy as np
import jax
import jax.numpy as jnp
from jax.experimental import pallas as pl
from jax.experimental.pallas import tpu as pltpu


def _round_up(x: int, m: int) -> int:
    return ((x + m - 1) // m) * m


# ----------------------------------------------------------------------------
# Deterministic parameter construction (synthetic weights, no checkpoint load)
# ----------------------------------------------------------------------------
def _random_unitary(n: int, seed: int = 0) -> np.ndarray:
    """Deterministic Haar-ish random unitary via QR of a complex Gaussian."""
    rng = np.random.default_rng(seed)
    z = rng.standard_normal((n, n)) + 1j * rng.standard_normal((n, n))
    q, r = np.linalg.qr(z)
    d = np.diag(r)
    q = q * (d / np.abs(d))
    return q


def construct_complementary_matrix(U_sub: np.ndarray, total_size: int) -> np.ndarray:
    """Faithful port of the reference helper (A=eye -> complementary block = I)."""
    m = U_sub.shape[0]
    n = total_size - m
    A = np.eye(n)
    Q, R = np.linalg.qr(A)
    for _ in range(3):
        Q, R = np.linalg.qr(Q)
        for j in range(n):
            Q[:, j] = Q[:, j] / np.linalg.norm(Q[:, j])
    D = np.diag(np.exp(-1j * np.angle(np.diag(Q))))
    U_comp = Q @ D
    U_total = np.zeros((total_size, total_size), dtype=complex)
    U_total[:m, :m] = U_sub
    U_total[m:, m:] = U_comp
    return U_total


def build_transformation(in_features: int, out_features: int,
                         device_max_inputs: int) -> np.ndarray:
    # TODO(synk): the Clements "square_decomposition"/Beamsplitter (theta, phi)
    # parametrization is unavailable; the decomposition reconstructs the same
    # unitary, so we use the unitary directly.
    effective = max(in_features, out_features)
    if effective < device_max_inputs:
        U_sub = _random_unitary(effective, seed=0)
        U_total = construct_complementary_matrix(U_sub, device_max_inputs)
    else:
        U_total = _random_unitary(device_max_inputs, seed=0)
    return U_total.astype(np.complex64)


# ----------------------------------------------------------------------------
# One-time host-side weight packing + config
# ----------------------------------------------------------------------------
class _OpticalConfig(NamedTuple):
    in_features: int
    out_features: int
    k_pad: int        # padded contraction dim (input features)
    n_pad: int        # padded output-feature dim
    max_tb: int       # max batch tile (rows)
    tk: int           # contraction tile
    tn: int           # output-feature tile
    compute_dtype: Any


def prepare_optical_layer(in_features: int, out_features: int,
                          device_max_inputs: int,
                          transformation: np.ndarray | None = None,
                          compute_dtype=jnp.bfloat16,
                          max_tb: int = 256, max_tk: int = 512,
                          max_tn: int = 256):
    """Builds the packed bf16 weight [re_tile | im_tile] per output tile (one-time)."""
    if device_max_inputs < max(in_features, out_features):
        raise ValueError(
            f"Number of modes ({device_max_inputs}) must be at least "
            f"{max(in_features, out_features)}")
    if transformation is None:
        transformation = build_transformation(in_features, out_features,
                                              device_max_inputs)
    T = np.asarray(transformation)

    # output = |x_pad @ T.T|[:, :out_features]; zero-padded x rows contribute
    # nothing and columns >= out_features are discarded, so only this sub-block
    # of T.T is needed:
    W_eff = T.T[:in_features, :out_features]          # (K, Nout), complex

    tk = min(max_tk, _round_up(in_features, 128))
    tn = min(max_tn, _round_up(out_features, 128))
    k_pad = _round_up(in_features, tk)
    n_pad = _round_up(out_features, tn)

    Wr = np.zeros((k_pad, n_pad), np.float32)
    Wi = np.zeros((k_pad, n_pad), np.float32)
    Wr[:in_features, :out_features] = np.real(W_eff)
    Wi[:in_features, :out_features] = np.imag(W_eff)

    # Pack so lane-block j (width 2*tn) = [re cols of tile j | im cols of tile j]:
    nj = n_pad // tn
    W_packed = np.concatenate(
        [Wr.reshape(k_pad, nj, 1, tn), Wi.reshape(k_pad, nj, 1, tn)], axis=2
    ).reshape(k_pad, nj * 2 * tn)                      # (k_pad, 2 * n_pad)

    cfg = _OpticalConfig(in_features, out_features, k_pad, n_pad,
                         max_tb, tk, tn, compute_dtype)
    w_dev = jnp.asarray(W_packed, dtype=compute_dtype)
    return w_dev, cfg


# ----------------------------------------------------------------------------
# Pallas kernel: acc += x_tile @ [Wr_tile | Wi_tile];  out = sqrt(re^2 + im^2)
# ----------------------------------------------------------------------------
def _optical_kernel(x_ref, w_ref, o_ref, acc_ref):
    # x_ref:   (tb, tk)        bf16
    # w_ref:   (tk, 2*tn)      bf16, packed [re | im] for this output tile
    # o_ref:   (tb, tn)        f32
    # acc_ref: (tb, 2*tn)      f32 VMEM accumulator, resident across the K axis
    k = pl.program_id(2)

    @pl.when(k == 0)
    def _():
        acc_ref[...] = jnp.zeros_like(acc_ref)

    acc_ref[...] += jnp.dot(x_ref[...], w_ref[...],
                            preferred_element_type=jnp.float32)

    @pl.when(k == pl.num_programs(2) - 1)
    def _():
        tn = o_ref.shape[-1]
        acc = acc_ref[...]
        re = acc[:, :tn]
        im = acc[:, tn:]
        o_ref[...] = jnp.sqrt(re * re + im * im).astype(o_ref.dtype)


@functools.partial(jax.jit, static_argnames=("cfg",))
def optical_linear_forward(x: jax.Array, w_packed: jax.Array,
                           cfg: _OpticalConfig) -> jax.Array:
    B = x.shape[0]
    tb = min(cfg.max_tb, _round_up(B, 8))
    b_pad = _round_up(B, tb)

    # Pad batch to a multiple of tb and features to k_pad; cast to compute dtype.
    x_p = jnp.zeros((b_pad, cfg.k_pad), dtype=cfg.compute_dtype)
    x_p = x_p.at[:B, :cfg.in_features].set(x.astype(cfg.compute_dtype))

    grid = (b_pad // tb, cfg.n_pad // cfg.tn, cfg.k_pad // cfg.tk)

    out = pl.pallas_call(
        _optical_kernel,
        out_shape=jax.ShapeDtypeStruct((b_pad, cfg.n_pad), jnp.float32),
        grid_spec=pltpu.PrefetchScalarGridSpec(
            num_scalar_prefetch=0,
            grid=grid,
            in_specs=[
                pl.BlockSpec((tb, cfg.tk), lambda i, j, k: (i, k)),
                pl.BlockSpec((cfg.tk, 2 * cfg.tn), lambda i, j, k: (k, j)),
            ],
            out_specs=pl.BlockSpec((tb, cfg.tn), lambda i, j, k: (i, j)),
            scratch_shapes=[pltpu.VMEM((tb, 2 * cfg.tn), jnp.float32)],
        ),
        compiler_params=pltpu.CompilerParams(
            dimension_semantics=("parallel", "parallel", "arbitrary")),
    )(x_p, w_packed)

    return out[:B, :cfg.out_features]


# ----------------------------------------------------------------------------
if __name__ == "__main__":
    in_features = 12
    out_features = 10
    device_max_inputs = 16
    batch = 8

    T = build_transformation(in_features, out_features, device_max_inputs)
    w_packed, cfg = prepare_optical_layer(in_features, out_features,
                                          device_max_inputs, transformation=T)

    key = jax.random.PRNGKey(0)
    x = jax.random.normal(key, (batch, in_features), dtype=jnp.float32)

    out = optical_linear_forward(x, w_packed, cfg)
    out = jax.block_until_ready(out)

    # Reference: plain complex math, same semantics as the torch forward.
    x_pad = jnp.pad(x, ((0, 0), (0, device_max_inputs - in_features)))
    ref = jnp.abs(x_pad.astype(jnp.complex64) @ jnp.asarray(T).T)[:, :out_features]

    assert out.shape == (batch, out_features)
    # bf16 inputs/weights with f32 accumulate -> loosened tolerance vs f32 ref.
    np.testing.assert_allclose(np.asarray(out), np.asarray(ref),
                               rtol=5e-2, atol=5e-2)

    print("KERNEL_OK")
</pallas_src>

<mosaic_0001>
module attributes {stable_mosaic.version = 11 : i64} {
  func.func @_optical_kernel(%arg0: i32, %arg1: i32, %arg2: i32, %arg3: memref<8x128xbf16, #tpu.memory_space<vmem>>, %arg4: memref<128x256xbf16, #tpu.memory_space<vmem>>, %arg5: memref<8x128xf32, #tpu.memory_space<vmem>>, %arg6: memref<8x256xf32, #tpu.memory_space<vmem>>) attributes {dimension_semantics = [#tpu.dimension_semantics<parallel>, #tpu.dimension_semantics<parallel>, #tpu.dimension_semantics<arbitrary>], iteration_bounds = array<i64: 1, 1, 1>, scalar_prefetch = 0 : i64, scratch_operands = 1 : i64, tpu.core_type = #tpu.core_type<tc>, window_params = [{transform_indices = @transform_0, window_bounds = array<i64: 8, 128>}, {transform_indices = @transform_1, window_bounds = array<i64: 128, 256>}, {transform_indices = @transform_2, window_bounds = array<i64: 8, 128>}]} {
    %c0_i32 = arith.constant 0 : i32
    %0 = arith.cmpi eq, %arg2, %c0_i32 : i32
    %1 = arith.extui %0 : i1 to i32
    %c0_i32_0 = arith.constant 0 : i32
    %2 = arith.cmpi ne, %1, %c0_i32_0 : i32
    scf.if %2 {
      %cst_10 = arith.constant 0.000000e+00 : f32
      %12 = vector.broadcast %cst_10 : f32 to vector<8x256xf32>
      %c0_11 = arith.constant 0 : index
      %c0_12 = arith.constant 0 : index
      %13 = vector.load %arg6[%c0_11, %c0_12] : memref<8x256xf32, #tpu.memory_space<vmem>>, vector<8x256xf32>
      tpu.vector_store %arg6[%c0_11, %c0_12], %12 {strides = array<i32>} : memref<8x256xf32, #tpu.memory_space<vmem>>, vector<8x256xf32>,
    } else {
    }
    %c0 = arith.constant 0 : index
    %c0_1 = arith.constant 0 : index
    %3 = vector.load %arg6[%c0, %c0_1] : memref<8x256xf32, #tpu.memory_space<vmem>>, vector<8x256xf32>
    %c0_2 = arith.constant 0 : index
    %c0_3 = arith.constant 0 : index
    %4 = vector.load %arg3[%c0_2, %c0_3] : memref<8x128xbf16, #tpu.memory_space<vmem>>, vector<8x128xbf16>
    %c0_4 = arith.constant 0 : index
    %c0_5 = arith.constant 0 : index
    %5 = vector.load %arg4[%c0_4, %c0_5] : memref<128x256xbf16, #tpu.memory_space<vmem>>, vector<128x256xbf16>
    %cst = arith.constant dense<0.000000e+00> : vector<8x256xf32>
    %6 = tpu.matmul %4, %5, %cst {dimension_numbers = #tpu.dot_dimension_numbers<[1], [0], [0], [1], [0, 0, 1, 1], [], []>} : vector<8x128xbf16>, vector<128x256xbf16>, vector<8x256xf32> -> vector<8x256xf32>
    %7 = arith.addf %3, %6 : vector<8x256xf32>
    %c0_6 = arith.constant 0 : index
    %c0_7 = arith.constant 0 : index
    %8 = vector.load %arg6[%c0_6, %c0_7] : memref<8x256xf32, #tpu.memory_space<vmem>>, vector<8x256xf32>
    tpu.vector_store %arg6[%c0_6, %c0_7], %7 {strides = array<i32>} : memref<8x256xf32, #tpu.memory_space<vmem>>, vector<8x256xf32>,
    %c0_i32_8 = arith.constant 0 : i32
    %9 = arith.cmpi eq, %arg2, %c0_i32_8 : i32
    %10 = arith.extui %9 : i1 to i32
    %c0_i32_9 = arith.constant 0 : i32
    %11 = arith.cmpi ne, %10, %c0_i32_9 : i32
    scf.if %11 {
      %c0_10 = arith.constant 0 : index
      %c0_11 = arith.constant 0 : index
      %12 = vector.load %arg6[%c0_10, %c0_11] : memref<8x256xf32, #tpu.memory_space<vmem>>, vector<8x256xf32>
      %13 = vector.extract_strided_slice %12 {offsets = [0, 0], sizes = [8, 128], strides = [1, 1]} : vector<8x256xf32> to vector<8x128xf32>
      %14 = vector.extract_strided_slice %12 {offsets = [0, 128], sizes = [8, 128], strides = [1, 1]} : vector<8x256xf32> to vector<8x128xf32>
      %15 = arith.mulf %13, %13 : vector<8x128xf32>
      %16 = arith.mulf %14, %14 : vector<8x128xf32>
      %17 = arith.addf %15, %16 : vector<8x128xf32>
      %18 = math.sqrt %17 : vector<8x128xf32>
      %c0_12 = arith.constant 0 : index
      %c0_13 = arith.constant 0 : index
      %19 = vector.load %arg5[%c0_12, %c0_13] : memref<8x128xf32, #tpu.memory_space<vmem>>, vector<8x128xf32>
      tpu.vector_store %arg5[%c0_12, %c0_13], %18 {strides = array<i32>} : memref<8x128xf32, #tpu.memory_space<vmem>>, vector<8x128xf32>,
    } else {
    }
    return
  }
  func.func @transform_0(%arg0: i32, %arg1: i32, %arg2: i32) -> (i32, i32) {
    %c0_i32 = arith.constant 0 : i32
    return %arg0, %arg2 : i32, i32
  }
  func.func @transform_1(%arg0: i32, %arg1: i32, %arg2: i32) -> (i32, i32) {
    %c0_i32 = arith.constant 0 : i32
    return %arg2, %arg1 : i32, i32
  }
  func.func @transform_2(%arg0: i32, %arg1: i32, %arg2: i32) -> (i32, i32) {
    %c0_i32 = arith.constant 0 : i32
    return %arg0, %arg1 : i32, i32
  }
}

</mosaic_0001>

<bundles_post_ra>
// kernel: optical_linear_forward.1
= control target key start
LH: loop header
LB: loop body
LE: loop exit
PB: predicated region body
PF: predicated region fallthrough
CT: control target
= control target key end

     0   :  { %7 = vsyncpa [#allocation4], 0  ;;  %s367_s0 = inlined_call_operand.vmem [shape: bf16[8,128], index: 0, kind: input, shape index: {}]   ;;  %s368_s1 = inlined_call_operand.hbm [shape: bf16[128,256], index: 1, kind: input, shape index: {}]   ;;  %s369_s2 = inlined_call_operand.hbm [shape: f32[8,128], index: 2, kind: output, shape index: {}]  }
   0x1   :  { %8 = vsyncpa [#allocation5], 0  ;;  %s15_s11 = sshll.u32 %s368_s1, 4  ;;  %s339_s12 = smov [#allocation3]   ;;  %s16_s11 = int_to_ptr.hbm [resolvable:$true] %s15_s11 }
   0x2   :  { %s17_s13 = sshll.u32 %s339_s12, 4  ;;  %s340_s14 = smov 128   ;;  %s18_s13 = int_to_ptr.vmem [resolvable:$true] %s17_s13 }
   0x3   :  { %s341_s15 = smov 8  }
   0x4   :  { %23 = dma.hbm_to_vmem [thread:$0]  %s16_s11, 2048, %s18_s13, [#allocation4], %s340_s14, %s340_s14, %s341_s15  }
   0x5   :  { %335 = dma.done.wait [#allocation4], 2048  }
   0x6   :  { %336 = vsyncadd [#allocation4], 4294965248  ;;  %v259_v0 = vld [vmem:[#allocation3 + $0x70] sm:$0xf]  ;;  %v280_v1 = vld [vmem:[#allocation3 + $0x74] sm:$0xf0] }
   0x7   :  { %v279_v2 = vld [vmem:[#allocation3 + $0x74] sm:$0xf]  ;;  %v260_v3 = vor.u32 %v280_v1, %v259_v0  ;;  %v261_v4 = vld [vmem:[#allocation3 + $0x78] sm:$0xf0]  ;;  %v251_v5 = vld [vmem:[#allocation3 + $0x60] sm:$0xf] }
   0x8   :  { %v278_v6 = vld [vmem:[#allocation3 + $0x64] sm:$0xf0]  ;;  %v264_v7 = vor.u32 %v279_v2, %v261_v4  ;;  %v277_v8 = vld [vmem:[#allocation3 + $0x64] sm:$0xf]  ;;  %v253_v9 = vld [vmem:[#allocation3 + $0x68] sm:$0xf0] }
   0x9   :  { %133 = vmatpush.bf16.msra.mxu0 %v260_v3  ;;  %v252_v10 = vor.u32 %v278_v6, %v251_v5  ;;  %v256_v11 = vor.u32 %v277_v8, %v253_v9  ;;  %v243_v12 = vld [vmem:[#allocation3 + $0x50] sm:$0xf]  ;;  %v276_v13 = vld [vmem:[#allocation3 + $0x54] sm:$0xf0]  ;;  %v275_v14 = vld [vmem:[#allocation3 + $0x54] sm:$0xf] }
   0xa   :  { %146 = vmatpush.bf16.msra.mxu1 %v264_v7  ;;  %v245_v15 = vld [vmem:[#allocation3 + $0x58] sm:$0xf0]  ;;  %v244_v16 = vor.u32 %v276_v13, %v243_v12  ;;  %v235_v18 = vld [vmem:[#allocation3 + $0x40] sm:$0xf]  ;;  %v274_v19 = vld [vmem:[#allocation3 + $0x44] sm:$0xf0] }
   0xb   :  { %v248_v17 = vor.u32 %v275_v14, %v245_v15  ;;  %v273_v20 = vld [vmem:[#allocation3 + $0x44] sm:$0xf]  ;;  %v237_v21 = vld [vmem:[#allocation3 + $0x48] sm:$0xf0]  ;;  %v236_v22 = vor.u32 %v274_v19, %v235_v18  ;;  %v227_v24 = vld [vmem:[#allocation3 + $0x30] sm:$0xf] }
   0xc   :  { %v240_v23 = vor.u32 %v273_v20, %v237_v21  ;;  %v272_v25 = vld [vmem:[#allocation3 + $0x34] sm:$0xf0]  ;;  %v271_v26 = vld [vmem:[#allocation3 + $0x34] sm:$0xf]  ;;  %v229_v27 = vld [vmem:[#allocation3 + $0x38] sm:$0xf0] }
   0xd   :  { %134 = vmatpush.bf16.msra.mxu0 %v252_v10  ;;  %v228_v28 = vor.u32 %v272_v25, %v227_v24  ;;  %v232_v29 = vor.u32 %v271_v26, %v229_v27  ;;  %v219_v30 = vld [vmem:[#allocation3 + $0x20] sm:$0xf]  ;;  %v270_v31 = vld [vmem:[#allocation3 + $0x24] sm:$0xf0]  ;;  %v269_v32 = vld [vmem:[#allocation3 + $0x24] sm:$0xf] }
   0xe   :  { %147 = vmatpush.bf16.msra.mxu1 %v256_v11  ;;  %v221_v33 = vld [vmem:[#allocation3 + $0x28] sm:$0xf0]  ;;  %v220_v34 = vor.u32 %v270_v31, %v219_v30  ;;  %v211_v36 = vld [vmem:[#allocation3 + $0x10] sm:$0xf]  ;;  %v268_v37 = vld [vmem:[#allocation3 + $0x14] sm:$0xf0] }
   0xf   :  { %v224_v35 = vor.u32 %v269_v32, %v221_v33  ;;  %v267_v38 = vld [vmem:[#allocation3 + $0x14] sm:$0xf]  ;;  %v213_v39 = vld [vmem:[#allocation3 + $0x18] sm:$0xf0]  ;;  %v212_v40 = vor.u32 %v268_v37, %v211_v36  ;;  %v203_v42 = vld [vmem:[#allocation3] sm:$0xf] }
  0x10   :  { %v216_v41 = vor.u32 %v267_v38, %v213_v39  ;;  %v266_v43 = vld [vmem:[#allocation3 + $0x4] sm:$0xf0]  ;;  %v265_v44 = vld [vmem:[#allocation3 + $0x4] sm:$0xf]  ;;  %v205_v45 = vld [vmem:[#allocation3 + $0x8] sm:$0xf0] }
  0x11   :  { %135 = vmatpush.bf16.msra.mxu0 %v244_v16  ;;  %v204_v46 = vor.u32 %v266_v43, %v203_v42  ;;  %v208_v47 = vor.u32 %v265_v44, %v205_v45  ;;  %v36_v48 = vld [vmem:[%s367_s0] sm:$0xf]  ;;  %s342_s17 = smov [#allocation6]   ;;  %s191_s20 = sshll.u32 %s369_s2, 4  ;;  %s192_s20 = int_to_ptr.hbm [resolvable:$true] %s191_s20 }
  0x12   :  { %148 = vmatpush.bf16.msra.mxu1 %v248_v17  ;;  %s189_s18 = sshll.u32 %s342_s17, 4  ;;  %s190_s18 = int_to_ptr.vmem [resolvable:$true] %s189_s18 }
  0x15   :  { %136 = vmatpush.bf16.msra.mxu0 %v236_v22 }
  0x16   :  { %149 = vmatpush.bf16.msra.mxu1 %v240_v23 }
  0x19   :  { %137 = vmatpush.bf16.msra.mxu0 %v228_v28 }
  0x1a   :  { %150 = vmatpush.bf16.msra.mxu1 %v232_v29 }
  0x1d   :  { %138 = vmatpush.bf16.msra.mxu0 %v220_v34 }
  0x1e   :  { %151 = vmatpush.bf16.msra.mxu1 %v224_v35 }
  0x21   :  { %139 = vmatpush.bf16.msra.mxu0 %v212_v40 }
  0x22   :  { %152 = vmatpush.bf16.msra.mxu1 %v216_v41 }
  0x25   :  { %140 = vmatpush.bf16.msra.mxu0 %v204_v46 }
  0x26   :  { %153 = vmatpush.bf16.msra.mxu1 %v208_v47 }
  0x28   :  { %141 = vmatmul.bf16.vlgmr.msra.gmra.mxu0 %v36_v48 }
  0x29   :  { %154 = vmatmul.bf16.vlgmr.msra.gmra.mxu1 %v36_v48 }
  0xa5   :  { %v142_v49 = vpop.f32.mrf.mxu0 }
  0xa6   :  { %v168_v50 = vmul.f32 %v142_v49, %v142_v49  ;;  %v155_v51 = vpop.f32.mrf.mxu1 }
  0xa7   :  { %v169_v52 = vmul.f32 %v155_v51, %v155_v51 }
  0xa9   :  { %v170_v53 = vadd.f32 %v169_v52, %v168_v50 }
  0xab   :  { %285 = vrsqrt.f32 %v170_v53  ;;  %vm178_vm0 = vcmp.eq.f32.partialorder %v170_v53, inf  ;;  %v181_v63 = vand.u32 2147483648, %v170_v53  ;;  %vm180_vm1 = vcmp.eq.f32.partialorder %v170_v53, 0.0 }
  0xad   :  { %v144_v54 = vpop.f32.mrf.mxu0 }
  0xae   :  { %v157_v55 = vpop.f32.mrf.mxu1 }
  0xb1   :  { %v286_v56 = vpop.eup %285 }
  0xb2   :  { %v172_v57 = vmul.f32 %v286_v56, %v170_v53 }
  0xb4   :  { %v173_v58 = vmul.f32 %v286_v56, %v172_v57 }
  0xb6   :  { %v174_v59 = vmul.f32 0.5, %v173_v58 }
  0xb8   :  { %v175_v60 = vsub.f32 1.5, %v174_v59 }
  0xba   :  { %v176_v61 = vmul.f32 %v286_v56, %v175_v60 }
  0xbc   :  { %v177_v62 = vmul.f32 %v176_v61, %v170_v53 }
  0xbe   :  { %v179_v0 = vsel %vm178_vm0, %v170_v53, %v177_v62 }
  0xbf   :  { %v182_v1 = vsel %vm180_vm1, %v181_v63, %v179_v0 }
  0xc0   :  { %183 = vst [vmem:[#allocation6] sm:$0xff] %v182_v1 }
  0xc1   :  { %194 = dma.vmem_to_hbm [thread:$0]  %s190_s18, 128, %s192_s20, [#allocation5]  }
  0xc2   :  { %337 = dma.done.wait [#allocation5], 128  }
  0xc3   :  { %338 = vsyncadd [#allocation5], 4294967168 }
  0xc4   :  { %199 = vsyncpa [#allocation4], 1 }
  0xc5   :  { %200 = vsyncpa [#allocation5], 1 }

</bundles_post_ra>
